<compile_context>
chip_gen: v7x
topology: tpu7x:2x2x1
jax: 0.10.0
libtpu: 0.0.40
codegen_flags: <defaults>
</compile_context>

<pallas_src>
import jax
import jax.numpy as jnp
from jax.experimental import pallas as pl
from jax.experimental.pallas import tpu as pltpu


def _round_up(v, m):
    return -(-v // m) * m


def _cdiv(a, b):
    return -(-a // b)


def mlp_kernel(x_ref, t_ref,
               w1x_ref, w1t_ref, b1_ref,
               w2_ref, b2_ref,
               w3_ref, b3_ref,
               w4_ref, b4_ref,
               o_ref):
    """Fused MLP on one (tb, .) batch tile: tanh x3 then linear output."""
    cdt = w2_ref.dtype                       # matmul/activation compute dtype
    x = x_ref[...].astype(cdt)
    t = t_ref[...].astype(cdt)

    # Layer 1: concat([x, t]) @ W1 + b1  ==  x @ W1x + t @ W1t + b1
    h = (jnp.dot(x, w1x_ref[...], preferred_element_type=jnp.float32)
         + jnp.dot(t, w1t_ref[...], preferred_element_type=jnp.float32)
         + b1_ref[...])
    # tanh in the compute dtype: bf16 on v6e/v7x fast path (bf16 EUP ~2x),
    # f32 on the v5e-safe path (compute_dtype=f32 there).
    h = jnp.tanh(h.astype(cdt))

    # Layer 2
    h = jnp.tanh((jnp.dot(h, w2_ref[...], preferred_element_type=jnp.float32)
                  + b2_ref[...]).astype(cdt))
    # Layer 3
    h = jnp.tanh((jnp.dot(h, w3_ref[...], preferred_element_type=jnp.float32)
                  + b3_ref[...]).astype(cdt))
    # Layer 4 (no activation): store at true output width (out_features).
    o_ref[...] = (jnp.dot(h, w4_ref[...], preferred_element_type=jnp.float32)
                  + b4_ref[...]).astype(o_ref.dtype)


def prepare_params(params, x_dim, *, compute_dtype=jnp.float32):
    """One-time weight prep (hoisted out of the forward hot path).

    params: list of (W, b) in PyTorch layout (out, in).
    Returns kernel-ready arrays: W transposed to (in, out), W1 split along
    the concat axis, biases kept in f32 as (1, out).  No output padding.
    Use compute_dtype=f32 on v5e (no bf16 VPU/EUP), bf16 on v6e/v7x.
    """
    (w1, b1), (w2, b2), (w3, b3), (w4, b4) = params
    w1T = jnp.asarray(w1).T.astype(compute_dtype)            # (in_features, mid)
    return dict(
        w1x=w1T[:x_dim], w1t=w1T[x_dim:],
        b1=jnp.asarray(b1, jnp.float32).reshape(1, -1),
        w2=jnp.asarray(w2).T.astype(compute_dtype),
        b2=jnp.asarray(b2, jnp.float32).reshape(1, -1),
        w3=jnp.asarray(w3).T.astype(compute_dtype),
        b3=jnp.asarray(b3, jnp.float32).reshape(1, -1),
        w4=jnp.asarray(w4).T.astype(compute_dtype),           # (2*mid, out)
        b4=jnp.asarray(b4, jnp.float32).reshape(1, -1),
        out_features=int(w4.shape[0]),
    )


def net_forward(x, t, prep, *, batch_tile=2048):
    """Forward pass of Net: tanh(L1)->tanh(L2)->tanh(L3)->L4."""
    batch = x.shape[0]
    x_dim, t_dim = x.shape[1], t.shape[1]
    out_features = prep["out_features"]

    weights = (prep["w1x"], prep["w1t"], prep["b1"],
               prep["w2"], prep["b2"],
               prep["w3"], prep["b3"],
               prep["w4"], prep["b4"])

    # ---- batch tiling ----------------------------------------------------
    # tb: multiple of 8 sublanes, large (2-8K) to amortize per-step overhead,
    # chosen so it usually divides the batch (no remainder pad), and with
    # >=2 grid steps whenever possible so ("parallel",) can shard across
    # v7x's two TensorCores.
    rounded = _round_up(batch, 8)
    n_tiles = _cdiv(rounded, _round_up(batch_tile, 8))
    if n_tiles < 2 and rounded >= 16:
        n_tiles = 2
    tb = _round_up(_cdiv(rounded, n_tiles), 8)
    padded_batch = tb * n_tiles

    if padded_batch != batch:                     # rare remainder-tile path
        pad = padded_batch - batch
        x = jnp.pad(x, ((0, pad), (0, 0)))
        t = jnp.pad(t, ((0, pad), (0, 0)))
    grid = (n_tiles,)

    args = (x, t) + weights

    def const_spec(a):
        nd = a.ndim
        return pl.BlockSpec(a.shape, lambda i, _nd=nd: (0,) * _nd)

    in_specs = [
        pl.BlockSpec((tb, x_dim), lambda i: (i, 0)),     # batch-tiled input x
        pl.BlockSpec((tb, t_dim), lambda i: (i, 0)),     # batch-tiled input t
    ] + [const_spec(a) for a in weights]                 # VMEM-resident params

    # True-width output block (block last dim == full array dim, legal <128).
    out_specs = pl.BlockSpec((tb, out_features), lambda i: (i, 0))

    # ---- advisory cost estimate (honest, unpadded output bytes) ----------
    mid, mid2 = prep["w2"].shape
    flops_per_row = 2 * ((x_dim + t_dim) * mid + mid * mid2
                         + mid2 * mid2 + mid2 * out_features)
    trans_per_row = mid + 2 * mid2
    weight_bytes = sum(int(a.size) * a.dtype.itemsize for a in weights)
    bytes_accessed = (int(x.size) * x.dtype.itemsize
                      + int(t.size) * t.dtype.itemsize
                      + padded_batch * out_features * 4
                      + weight_bytes)
    cost = pl.CostEstimate(flops=padded_batch * flops_per_row,
                           transcendentals=padded_batch * trans_per_row,
                           bytes_accessed=bytes_accessed)

    # ---- VMEM budget: double-buffered I/O + resident weights + slack -----
    vmem_est = (2 * tb * (x_dim + t_dim) * 4          # input double buffers
                + 2 * tb * out_features * 4           # output double buffers
                + weight_bytes                        # resident weights
                + 4 * tb * (mid + 2 * mid2) * 4)      # f32 intermediates slack
    vmem_limit = int(min(max(2 * vmem_est, 32 << 20), 48 << 20))  # < v7x 64 MiB

    out = pl.pallas_call(
        mlp_kernel,
        out_shape=jax.ShapeDtypeStruct((padded_batch, out_features),
                                       jnp.float32),
        grid_spec=pltpu.PrefetchScalarGridSpec(
            num_scalar_prefetch=0,
            grid=grid,
            in_specs=in_specs,
            out_specs=out_specs,
        ),
        compiler_params=pltpu.CompilerParams(
            dimension_semantics=("parallel",),        # megacore split on v7x
            vmem_limit_bytes=vmem_limit),
        cost_estimate=cost,
    )(*args)

    # Only a row slice remains (and only when a remainder tile was padded).
    return out if padded_batch == batch else out[:batch]


# ---------------------------------------------------------------------------
# Parameter construction + pure-JAX reference (PyTorch nn.Linear semantics).
# ---------------------------------------------------------------------------
def init_linear(key, in_f, out_f):
    kw, kb = jax.random.split(key)
    bound = 1.0 / jnp.sqrt(jnp.float32(in_f))
    w = jax.random.uniform(kw, (out_f, in_f), jnp.float32, -bound, bound)
    b = jax.random.uniform(kb, (out_f,), jnp.float32, -bound, bound)
    return w, b


def make_params(key, in_features, mid_features, out_features):
    dims = [(in_features, mid_features * 1),
            (mid_features * 1, mid_features * 2),
            (mid_features * 2, mid_features * 2),
            (mid_features * 2, out_features)]
    keys = jax.random.split(key, len(dims))
    return [init_linear(k, i, o) for k, (i, o) in zip(keys, dims)]


def reference_forward(x, t, params):
    h = jnp.concatenate([x, t], axis=1)
    for (w, b) in params[:-1]:
        h = jnp.tanh(h @ w.T + b)
    w, b = params[-1]
    return h @ w.T + b


if __name__ == "__main__":
    key = jax.random.PRNGKey(0)
    k_x, k_t, k_p = jax.random.split(key, 3)

    batch = 8
    x_dim, t_dim = 3, 1            # in_features = x_dim + t_dim = 4
    mid_features = 32
    out_features = 2

    x = jax.random.normal(k_x, (batch, x_dim), jnp.float32)
    t = jax.random.normal(k_t, (batch, t_dim), jnp.float32)
    params = make_params(k_p, x_dim + t_dim, mid_features, out_features)

    ref = reference_forward(x, t, params)

    # f32 path (v5e-safe, bit-faithful to the PyTorch module semantics).
    prep_f32 = prepare_params(params, x_dim, compute_dtype=jnp.float32)
    out_f32 = net_forward(x, t, prep_f32)
    jax.block_until_ready(out_f32)
    assert out_f32.shape == (batch, out_features)
    assert jnp.allclose(out_f32, ref, atol=1e-5, rtol=1e-5)

    # bf16 matmul + bf16-tanh path (v6e/v7x fast path; f32 accumulation).
    prep_bf16 = prepare_params(params, x_dim, compute_dtype=jnp.bfloat16)
    out_bf16 = net_forward(x, t, prep_bf16)
    jax.block_until_ready(out_bf16)
    assert out_bf16.shape == (batch, out_features)
    assert jnp.allclose(out_bf16, ref, atol=1e-1, rtol=1e-1)

    # Multi-step grid + ragged-batch path (small forced tile exercises the
    # remainder padding and the per-tile weight residency).
    k_x2, k_t2 = jax.random.split(jax.random.PRNGKey(1))
    batch2 = 100
    x2 = jax.random.normal(k_x2, (batch2, x_dim), jnp.float32)
    t2 = jax.random.normal(k_t2, (batch2, t_dim), jnp.float32)
    ref2 = reference_forward(x2, t2, params)
    out2 = net_forward(x2, t2, prep_f32, batch_tile=32)
    jax.block_until_ready(out2)
    assert out2.shape == (batch2, out_features)
    assert jnp.allclose(out2, ref2, atol=1e-5, rtol=1e-5)

    print("KERNEL_OK")
</pallas_src>

<mosaic_0001>
module attributes {stable_mosaic.version = 11 : i64} {
  func.func @mlp_kernel(%arg0: i32, %arg1: memref<8x3xf32, #tpu.memory_space<vmem>>, %arg2: memref<8x1xf32, #tpu.memory_space<vmem>>, %arg3: memref<3x32xf32, #tpu.memory_space<vmem>>, %arg4: memref<1x32xf32, #tpu.memory_space<vmem>>, %arg5: memref<1x32xf32, #tpu.memory_space<vmem>>, %arg6: memref<32x64xf32, #tpu.memory_space<vmem>>, %arg7: memref<1x64xf32, #tpu.memory_space<vmem>>, %arg8: memref<64x64xf32, #tpu.memory_space<vmem>>, %arg9: memref<1x64xf32, #tpu.memory_space<vmem>>, %arg10: memref<64x2xf32, #tpu.memory_space<vmem>>, %arg11: memref<1x2xf32, #tpu.memory_space<vmem>>, %arg12: memref<8x2xf32, #tpu.memory_space<vmem>>) attributes {dimension_semantics = [#tpu.dimension_semantics<parallel>], iteration_bounds = array<i64: 1>, scalar_prefetch = 0 : i64, scratch_operands = 0 : i64, tpu.core_type = #tpu.core_type<tc>, window_params = [{transform_indices = @transform_0, window_bounds = array<i64: 8, 3>}, {transform_indices = @transform_1, window_bounds = array<i64: 8, 1>}, {pipeline_mode = #tpu.pipeline_mode<synchronous>, transform_indices = @transform_2, window_bounds = array<i64: 3, 32>}, {pipeline_mode = #tpu.pipeline_mode<synchronous>, transform_indices = @transform_3, window_bounds = array<i64: 1, 32>}, {pipeline_mode = #tpu.pipeline_mode<synchronous>, transform_indices = @transform_4, window_bounds = array<i64: 1, 32>}, {pipeline_mode = #tpu.pipeline_mode<synchronous>, transform_indices = @transform_5, window_bounds = array<i64: 32, 64>}, {pipeline_mode = #tpu.pipeline_mode<synchronous>, transform_indices = @transform_6, window_bounds = array<i64: 1, 64>}, {pipeline_mode = #tpu.pipeline_mode<synchronous>, transform_indices = @transform_7, window_bounds = array<i64: 64, 64>}, {pipeline_mode = #tpu.pipeline_mode<synchronous>, transform_indices = @transform_8, window_bounds = array<i64: 1, 64>}, {pipeline_mode = #tpu.pipeline_mode<synchronous>, transform_indices = @transform_9, window_bounds = array<i64: 64, 2>}, {pipeline_mode = #tpu.pipeline_mode<synchronous>, transform_indices = @transform_10, window_bounds = array<i64: 1, 2>}, {transform_indices = @transform_11, window_bounds = array<i64: 8, 2>}]} {
    %c0 = arith.constant 0 : index
    %c0_0 = arith.constant 0 : index
    %0 = vector.load %arg1[%c0, %c0_0] : memref<8x3xf32, #tpu.memory_space<vmem>>, vector<8x3xf32>
    %c0_1 = arith.constant 0 : index
    %c0_2 = arith.constant 0 : index
    %1 = vector.load %arg2[%c0_1, %c0_2] : memref<8x1xf32, #tpu.memory_space<vmem>>, vector<8x1xf32>
    %c0_3 = arith.constant 0 : index
    %c0_4 = arith.constant 0 : index
    %2 = vector.load %arg3[%c0_3, %c0_4] : memref<3x32xf32, #tpu.memory_space<vmem>>, vector<3x32xf32>
    %cst = arith.constant dense<0.000000e+00> : vector<8x32xf32>
    %3 = tpu.matmul %0, %2, %cst {dimension_numbers = #tpu.dot_dimension_numbers<[1], [0], [0], [1], [0, 0, 1, 1], [], []>} : vector<8x3xf32>, vector<3x32xf32>, vector<8x32xf32> -> vector<8x32xf32>
    %c0_5 = arith.constant 0 : index
    %c0_6 = arith.constant 0 : index
    %4 = vector.load %arg4[%c0_5, %c0_6] : memref<1x32xf32, #tpu.memory_space<vmem>>, vector<1x32xf32>
    %cst_7 = arith.constant dense<0.000000e+00> : vector<8x32xf32>
    %5 = tpu.matmul %1, %4, %cst_7 {dimension_numbers = #tpu.dot_dimension_numbers<[1], [0], [0], [1], [0, 0, 1, 1], [], []>} : vector<8x1xf32>, vector<1x32xf32>, vector<8x32xf32> -> vector<8x32xf32>
    %6 = arith.addf %3, %5 : vector<8x32xf32>
    %c0_8 = arith.constant 0 : index
    %c0_9 = arith.constant 0 : index
    %7 = vector.load %arg5[%c0_8, %c0_9] : memref<1x32xf32, #tpu.memory_space<vmem>>, vector<1x32xf32>
    %8 = vector.broadcast %7 : vector<1x32xf32> to vector<8x32xf32>
    %9 = arith.addf %6, %8 : vector<8x32xf32>
    %10 = math.tanh %9 : vector<8x32xf32>
    %c0_10 = arith.constant 0 : index
    %c0_11 = arith.constant 0 : index
    %11 = vector.load %arg6[%c0_10, %c0_11] : memref<32x64xf32, #tpu.memory_space<vmem>>, vector<32x64xf32>
    %cst_12 = arith.constant dense<0.000000e+00> : vector<8x64xf32>
    %12 = tpu.matmul %10, %11, %cst_12 {dimension_numbers = #tpu.dot_dimension_numbers<[1], [0], [0], [1], [0, 0, 1, 1], [], []>} : vector<8x32xf32>, vector<32x64xf32>, vector<8x64xf32> -> vector<8x64xf32>
    %c0_13 = arith.constant 0 : index
    %c0_14 = arith.constant 0 : index
    %13 = vector.load %arg7[%c0_13, %c0_14] : memref<1x64xf32, #tpu.memory_space<vmem>>, vector<1x64xf32>
    %14 = vector.broadcast %13 : vector<1x64xf32> to vector<8x64xf32>
    %15 = arith.addf %12, %14 : vector<8x64xf32>
    %16 = math.tanh %15 : vector<8x64xf32>
    %c0_15 = arith.constant 0 : index
    %c0_16 = arith.constant 0 : index
    %17 = vector.load %arg8[%c0_15, %c0_16] : memref<64x64xf32, #tpu.memory_space<vmem>>, vector<64x64xf32>
    %cst_17 = arith.constant dense<0.000000e+00> : vector<8x64xf32>
    %18 = tpu.matmul %16, %17, %cst_17 {dimension_numbers = #tpu.dot_dimension_numbers<[1], [0], [0], [1], [0, 0, 1, 1], [], []>} : vector<8x64xf32>, vector<64x64xf32>, vector<8x64xf32> -> vector<8x64xf32>
    %c0_18 = arith.constant 0 : index
    %c0_19 = arith.constant 0 : index
    %19 = vector.load %arg9[%c0_18, %c0_19] : memref<1x64xf32, #tpu.memory_space<vmem>>, vector<1x64xf32>
    %20 = vector.broadcast %19 : vector<1x64xf32> to vector<8x64xf32>
    %21 = arith.addf %18, %20 : vector<8x64xf32>
    %22 = math.tanh %21 : vector<8x64xf32>
    %c0_20 = arith.constant 0 : index
    %c0_21 = arith.constant 0 : index
    %23 = vector.load %arg10[%c0_20, %c0_21] : memref<64x2xf32, #tpu.memory_space<vmem>>, vector<64x2xf32>
    %cst_22 = arith.constant dense<0.000000e+00> : vector<8x2xf32>
    %24 = tpu.matmul %22, %23, %cst_22 {dimension_numbers = #tpu.dot_dimension_numbers<[1], [0], [0], [1], [0, 0, 1, 1], [], []>} : vector<8x64xf32>, vector<64x2xf32>, vector<8x2xf32> -> vector<8x2xf32>
    %c0_23 = arith.constant 0 : index
    %c0_24 = arith.constant 0 : index
    %25 = vector.load %arg11[%c0_23, %c0_24] : memref<1x2xf32, #tpu.memory_space<vmem>>, vector<1x2xf32>
    %26 = vector.broadcast %25 : vector<1x2xf32> to vector<8x2xf32>
    %27 = arith.addf %24, %26 : vector<8x2xf32>
    %c0_25 = arith.constant 0 : index
    %c0_26 = arith.constant 0 : index
    %28 = vector.load %arg12[%c0_25, %c0_26] : memref<8x2xf32, #tpu.memory_space<vmem>>, vector<8x2xf32>
    tpu.vector_store %arg12[%c0_25, %c0_26], %27 {strides = array<i32>} : memref<8x2xf32, #tpu.memory_space<vmem>>, vector<8x2xf32>,
    return
  }
  func.func @transform_0(%arg0: i32) -> (i32, i32) {
    %c0_i32 = arith.constant 0 : i32
    %c0_i32_0 = arith.constant 0 : i32
    return %arg0, %c0_i32 : i32, i32
  }
  func.func @transform_1(%arg0: i32) -> (i32, i32) {
    %c0_i32 = arith.constant 0 : i32
    %c0_i32_0 = arith.constant 0 : i32
    return %arg0, %c0_i32 : i32, i32
  }
  func.func @transform_2(%arg0: i32) -> (i32, i32) {
    %c0_i32 = arith.constant 0 : i32
    %c0_i32_0 = arith.constant 0 : i32
    %c0_i32_1 = arith.constant 0 : i32
    return %c0_i32, %c0_i32_0 : i32, i32
  }
  func.func @transform_3(%arg0: i32) -> (i32, i32) {
    %c0_i32 = arith.constant 0 : i32
    %c0_i32_0 = arith.constant 0 : i32
    %c0_i32_1 = arith.constant 0 : i32
    return %c0_i32, %c0_i32_0 : i32, i32
  }
  func.func @transform_4(%arg0: i32) -> (i32, i32) {
    %c0_i32 = arith.constant 0 : i32
    %c0_i32_0 = arith.constant 0 : i32
    %c0_i32_1 = arith.constant 0 : i32
    return %c0_i32, %c0_i32_0 : i32, i32
  }
  func.func @transform_5(%arg0: i32) -> (i32, i32) {
    %c0_i32 = arith.constant 0 : i32
    %c0_i32_0 = arith.constant 0 : i32
    %c0_i32_1 = arith.constant 0 : i32
    return %c0_i32, %c0_i32_0 : i32, i32
  }
  func.func @transform_6(%arg0: i32) -> (i32, i32) {
    %c0_i32 = arith.constant 0 : i32
    %c0_i32_0 = arith.constant 0 : i32
    %c0_i32_1 = arith.constant 0 : i32
    return %c0_i32, %c0_i32_0 : i32, i32
  }
  func.func @transform_7(%arg0: i32) -> (i32, i32) {
    %c0_i32 = arith.constant 0 : i32
    %c0_i32_0 = arith.constant 0 : i32
    %c0_i32_1 = arith.constant 0 : i32
    return %c0_i32, %c0_i32_0 : i32, i32
  }
  func.func @transform_8(%arg0: i32) -> (i32, i32) {
    %c0_i32 = arith.constant 0 : i32
    %c0_i32_0 = arith.constant 0 : i32
    %c0_i32_1 = arith.constant 0 : i32
    return %c0_i32, %c0_i32_0 : i32, i32
  }
  func.func @transform_9(%arg0: i32) -> (i32, i32) {
    %c0_i32 = arith.constant 0 : i32
    %c0_i32_0 = arith.constant 0 : i32
    %c0_i32_1 = arith.constant 0 : i32
    return %c0_i32, %c0_i32_0 : i32, i32
  }
  func.func @transform_10(%arg0: i32) -> (i32, i32) {
    %c0_i32 = arith.constant 0 : i32
    %c0_i32_0 = arith.constant 0 : i32
    %c0_i32_1 = arith.constant 0 : i32
    return %c0_i32, %c0_i32_0 : i32, i32
  }
  func.func @transform_11(%arg0: i32) -> (i32, i32) {
    %c0_i32 = arith.constant 0 : i32
    %c0_i32_0 = arith.constant 0 : i32
    return %arg0, %c0_i32 : i32, i32
  }
}

</mosaic_0001>

<bundles_post_ra>
// kernel: tpu_custom_call.1
= control target key start
LH: loop header
LB: loop body
LE: loop exit
PB: predicated region body
PF: predicated region fallthrough
CT: control target
= control target key end

     0   :  { %vm46_vm0 = vcmask 1040384   ;;  %vm42_vm1 = vcmask 7168   ;;  %v613_v0 = vmov 0.0   ;;  %vm614_vm2 = vmmov 0   ;;  %s780_s3 = inlined_call_operand.vmem [shape: f32[1,32], index: 3, kind: input, shape index: {}]   ;;  %s781_s1 = inlined_call_operand.vmem [shape: f32[8,1], index: 1, kind: input, shape index: {}]   ;;  %s782_s2 = inlined_call_operand.vmem [shape: f32[3,32], index: 2, kind: input, shape index: {}]   ;;  %s783_s0 = inlined_call_operand.vmem [shape: f32[8,3], index: 0, kind: input, shape index: {}]   ;;  %s784_s5 = inlined_call_operand.vmem [shape: f32[32,64], index: 5, kind: input, shape index: {}]   ;;  %s785_s7 = inlined_call_operand.vmem [shape: f32[64,64], index: 7, kind: input, shape index: {}]   ;;  %s786_s4 = inlined_call_operand.vmem [shape: f32[1,32], index: 4, kind: input, shape index: {}]   ;;  %s787_s9 = inlined_call_operand.vmem [shape: f32[64,2], index: 9, kind: input, shape index: {}]   ;;  %s788_s6 = inlined_call_operand.vmem [shape: f32[1,64], index: 6, kind: input, shape index: {}]   ;;  %s789_s8 = inlined_call_operand.vmem [shape: f32[1,64], index: 8, kind: input, shape index: {}]   ;;  %s790_s10 = inlined_call_operand.vmem [shape: f32[1,2], index: 10, kind: input, shape index: {}]   ;;  %s791_s11 = inlined_call_operand.vmem [shape: f32[8,2], index: 11, kind: output, shape index: {}]  }
   0x1   :  { %515 = vmatprep.subr.mxu1 %v613_v0  ;;  %v41_v1 = vld [vmem:[%s780_s3] sm:$0x1]  ;;  %517 = vmatprep.mubr.msk.f32.mxu1 %vm614_vm2, %v613_v0  ;;  %vm124_vm3 = vcmask 1042432   ;;  %vm120_vm4 = vcmask 23552   ;;  %v615_v5 = vmov 0.0|0.0   ;;  %v208_v7 = vld [vmem:[%s784_s5 + $0x8] sm:$0xff] }
   0x2   :  { %v39_v2 = vld [vmem:[%s781_s1] sm:$0xff]  ;;  %516 = vmatpush3.msk.msra.mxu1 %vm46_vm0, %v41_v1  ;;  %533 = vmatprep.mubr.msk.f32.mxu0 %vm614_vm2, %v613_v0  ;;  %v209_v8 = vld [vmem:[%s784_s5 + $0x10] sm:$0xff]  ;;  %v210_v10 = vld [vmem:[%s784_s5 + $0x18] sm:$0xff]  ;;  %vm218_vm5 = vcmask 261120   ;;  %vm308_vm6 = vcmask 523264   ;;  %vm471_vm7 = vcmask 15360  }
   0x3   :  { %v40_v3 = vld [vmem:[%s782_s2] sm:$0x7]  ;;  %518 = vmatmul.mubr.msk.f32.vlgmr.msra.gmra.mrb[0].mxu1 %vm42_vm1, %v39_v2  ;;  %520 = vmatprep.subr.mxu1 %v613_v0  ;;  %v578_v11 = vpack.c.bf16 %v210_v10, %v209_v8  ;;  %v294_v13 = vld [vmem:[%s785_s7 + $0x8] sm:$0xff]  ;;  %v295_v23 = vld [vmem:[%s785_s7 + $0x10] sm:$0xff] }
   0x4   :  { %521 = vmatpush3.msk.msra.mxu1 %vm124_vm3, %v40_v3  ;;  %522 = vmatprep.mubr.msk.f32.mxu1 %vm614_vm2, %v613_v0  ;;  %v38_v4 = vld [vmem:[%s783_s0] sm:$0xff]  ;;  %v296_v24 = vld [vmem:[%s785_s7 + $0x18] sm:$0xff]  ;;  %v298_v27 = vld [vmem:[%s785_s7 + $0x28] sm:$0xff] }
   0x5   :  { %574 = vmatprep.subr.bf16.mxu0 %v615_v5  ;;  %v207_v6 = vld [vmem:[%s784_s5] sm:$0xff]  ;;  %580 = vmatprep.subr.bf16.mxu1 %v615_v5  ;;  %v584_v25 = vpack.c.bf16 %v296_v24, %v295_v23  ;;  %v299_v29 = vld [vmem:[%s785_s7 + $0x30] sm:$0xff]  ;;  %v300_v30 = vld [vmem:[%s785_s7 + $0x38] sm:$0xff] }
   0x6   :  { %v575_v9 = vpack.c.bf16 %v208_v7, %v207_v6  ;;  %v293_v12 = vld [vmem:[%s785_s7] sm:$0xff]  ;;  %v590_v31 = vpack.c.bf16 %v300_v30, %v299_v29  ;;  %v384_v33 = vld [vmem:[%s787_s9 + $0x8] sm:$0xff]  ;;  %v385_v40 = vld [vmem:[%s787_s9 + $0x10] sm:$0xff] }
   0x7   :  { %523 = vmatmul.mubr.msk.f32.vlgmr.msra.gmra.mrb[2].mxu1 %vm120_vm4, %v38_v4  ;;  %v581_v14 = vpack.c.bf16 %v294_v13, %v293_v12  ;;  %v481_v18 = vld [vmem:[%s786_s4] ss:$0 sm:$0xff]  ;;  %v386_v41 = vld [vmem:[%s787_s9 + $0x18] sm:$0xff]  ;;  %v388_v44 = vld [vmem:[%s787_s9 + $0x28] sm:$0xff] }
   0x8   :  { %552 = vmatprep.mubr.msk.f32.mxu1 %vm614_vm2, %v613_v0  ;;  %576 = vmatpush3.bf16.msra.mxu0 %v575_v9  ;;  %v297_v26 = vld [vmem:[%s785_s7 + $0x20] sm:$0xff]  ;;  %v596_v42 = vpack.c.bf16 %v386_v41, %v385_v40  ;;  %v389_v46 = vld [vmem:[%s787_s9 + $0x30] sm:$0xff]  ;;  %v390_v47 = vld [vmem:[%s787_s9 + $0x38] sm:$0xff] }
   0x9   :  { %577 = vmatprep.subr.bf16.mxu0 %v615_v5  ;;  %582 = vmatpush3.bf16.msra.mxu1 %v581_v14  ;;  %v587_v28 = vpack.c.bf16 %v298_v27, %v297_v26  ;;  %v383_v32 = vld [vmem:[%s787_s9] sm:$0xff]  ;;  %v602_v48 = vpack.c.bf16 %v390_v47, %v389_v46 }
   0xa   :  { %583 = vmatprep.subr.bf16.mxu1 %v615_v5  ;;  %v593_v34 = vpack.c.bf16 %v384_v33, %v383_v32  ;;  %v482_v35 = vld [vmem:[%s788_s6] ss:$0 sm:$0xff] }
   0xb   :  { %v387_v43 = vld [vmem:[%s787_s9 + $0x20] sm:$0xff] }
   0xc   :  { %579 = vmatpush3.bf16.msra.mxu0 %v578_v11  ;;  %v599_v45 = vpack.c.bf16 %v388_v44, %v387_v43  ;;  %v484_v49 = vld [vmem:[%s789_s8] ss:$0 sm:$0xff] }
   0xd   :  { %592 = vmatprep.subr.bf16.mxu0 %v615_v5  ;;  %585 = vmatpush3.bf16.msra.mxu1 %v584_v25  ;;  %v486_v54 = vld [vmem:[%s790_s10] ss:$0 sm:$0xff] }
   0xe   :  { %586 = vmatprep.subr.bf16.mxu1 %v615_v5 }
  0x11   :  { %588 = vmatpush3.bf16.msra.mxu1 %v587_v28 }
  0x12   :  { %589 = vmatprep.subr.bf16.mxu1 %v615_v5 }
  0x15   :  { %591 = vmatpush3.bf16.msra.mxu1 %v590_v31 }
  0xd6   :  { %v116_v15 = vpop.f32.mrb[0].mxu1 }
  0xd7   :  { %v519_v16 = vpop.f32.mrb[1].mxu1 }
  0xda   :  { %v194_v17 = vpop.f32.mrb[2].mxu1 }
  0xdb   :  { %v195_v19 = vadd.f32 %v194_v17, %v116_v15  ;;  %v524_v20 = vpop.f32.mrb[3].mxu1 }
  0xdd   :  { %v205_v21 = vadd.f32 %v481_v18, %v195_v19 }
  0xdf   :  { %607 = vtanh.f32 %v205_v21 }
  0xe9   :  { %v608_v22 = vpop.eup %607 }
  0xea   :  { %534 = vmatmul.mubr.msk.f32.vlgmr.msra.gmra.mrb[0].mxu0 %vm218_vm5, %v608_v22 }
  0xeb   :  { %571 = vmatprep.mubr.msk.f32.mxu0 %vm614_vm2, %v613_v0  ;;  %594 = vmatpush3.bf16.msra.mxu0 %v593_v34 }
  0xec   :  { %595 = vmatprep.subr.bf16.mxu0 %v615_v5 }
  0xef   :  { %597 = vmatpush3.bf16.msra.mxu0 %v596_v42 }
  0xf0   :  { %598 = vmatprep.subr.bf16.mxu0 %v615_v5 }
  0xf3   :  { %600 = vmatpush3.bf16.msra.mxu0 %v599_v45 }
  0xf4   :  { %601 = vmatprep.subr.bf16.mxu0 %v615_v5 }
  0xf7   :  { %603 = vmatpush3.bf16.msra.mxu0 %v602_v48 }
 0x1bd   :  { %v288_v36 = vpop.f32.mrb[0].mxu0 }
 0x1be   :  { %v289_v37 = vadd.f32 %v482_v35, %v288_v36  ;;  %v535_v38 = vpop.f32.mrb[1].mxu0 }
 0x1c0   :  { %609 = vtanh.f32 %v289_v37 }
 0x1ca   :  { %v610_v39 = vpop.eup %609 }
 0x1cb   :  { %553 = vmatmul.mubr.msk.f32.vlgmr.msra.gmra.mrb[4].mxu1 %vm308_vm6, %v610_v39 }
 0x29e   :  { %v378_v50 = vpop.f32.mrb[4].mxu1 }
 0x29f   :  { %v379_v51 = vadd.f32 %v484_v49, %v378_v50  ;;  %v554_v52 = vpop.f32.mrb[5].mxu1 }
 0x2a1   :  { %611 = vtanh.f32 %v379_v51 }
 0x2ab   :  { %v612_v53 = vpop.eup %611 }
 0x2ac   :  { %572 = vmatmul.mubr.msk.f32.vlgmr.msra.gmra.mrb[2].mxu0 %vm308_vm6, %v612_v53 }
 0x37f   :  { %v467_v55 = vpop.f32.mrb[2].mxu0 }
 0x380   :  { %v468_v56 = vadd.f32 %v486_v54, %v467_v55  ;;  %v573_v57 = vpop.f32.mrb[3].mxu0 }
 0x382   :  { %472 = vst.msk [vmem:[%s791_s11] sm:$0xff] %vm471_vm7, %v468_v56 }

</bundles_post_ra>
